<compile_context>
chip_gen: v5e
topology: v5e:2x2
jax: 0.10.0
libtpu: 0.0.40
codegen_flags: <defaults>
</compile_context>

<pallas_src>
import functools

import jax
import jax.numpy as jnp
from jax.experimental import pallas as pl
from jax.experimental.pallas import tpu as pltpu

LANE = 128  # TPU lane width; fc3 output is padded to this for dense stores.


def _round_up(x, m):
    return ((x + m - 1) // m) * m


def dqn_kernel(x_ref, w1_ref, b1_ref, w2_ref, b2_ref, w3_ref, b3_ref, o_ref):
    # x tile: (TILE_M, 16) f32 in VMEM; cast to bf16 here (no HBM-side copy).
    # Weights/biases are pre-cast bf16. All matmuls accumulate in f32 on the
    # MXU; epilogues (bias + ReLU) run in bf16 after one accumulator cast.
    x = x_ref[...].astype(jnp.bfloat16)
    h1 = jnp.dot(x, w1_ref[...],
                 preferred_element_type=jnp.float32).astype(jnp.bfloat16)
    h1 = jnp.maximum(h1 + b1_ref[...], 0)
    h2 = jnp.dot(h1, w2_ref[...],
                 preferred_element_type=jnp.float32).astype(jnp.bfloat16)
    h2 = jnp.maximum(h2 + b2_ref[...], 0)
    out = jnp.dot(h2, w3_ref[...],
                  preferred_element_type=jnp.float32).astype(jnp.bfloat16)
    o_ref[...] = out + b3_ref[...]


def prepare_params(params):
    """One-time (per weight update) conversion: bf16 weights/biases, fc3
    weight/bias zero-padded to 128 output lanes. Do NOT call per step."""
    w1, b1, w2, b2, w3, b3 = params
    hidden = w1.shape[1]
    out_size = w3.shape[1]
    out_pad = _round_up(out_size, LANE)
    w3p = jnp.zeros((hidden, out_pad), jnp.float32).at[:, :out_size].set(w3)
    b3p = jnp.zeros((1, out_pad), jnp.float32).at[:, :out_size].set(b3)
    return (w1.astype(jnp.bfloat16), b1.astype(jnp.bfloat16),
            w2.astype(jnp.bfloat16), b2.astype(jnp.bfloat16),
            w3p.astype(jnp.bfloat16), b3p.astype(jnp.bfloat16))


@functools.partial(jax.jit,
                   static_argnames=("out_size", "tile_m", "min_rows_per_core"))
def dqn_forward(x, prepared_params, out_size=4, tile_m=2048,
                min_rows_per_core=256):
    """Forward pass. x: (batch, input_size) f32, prepared_params from
    prepare_params(). Returns (batch, out_size) f32 Q-values."""
    w1b, b1b, w2b, b2b, w3b, b3b = prepared_params
    batch, in_size = x.shape
    hidden = w1b.shape[1]
    out_pad = w3b.shape[1]

    # Tiling policy:
    #  * small batch (action selection): one tile equal to the full batch
    #    (block == full array dim, so no 8-row alignment padding needed).
    #  * large batch (replay buffer): >=2 tiles of 8-aligned rows (capped at
    #    tile_m) so v7x's two TensorCores both get work; pad batch minimally.
    if batch <= min_rows_per_core:
        tm = batch
    else:
        tm = min(_round_up(tile_m, 8), _round_up(pl.cdiv(batch, 2), 8))
        tm = max(tm, 8)
    n_tiles = pl.cdiv(batch, tm)
    batch_pad = n_tiles * tm
    if batch_pad != batch:
        x = jnp.pad(x, ((0, batch_pad - batch), (0, 0)))  # f32, tiny

    flops = 2 * batch_pad * (in_size * hidden + hidden * hidden
                             + hidden * out_pad)
    bytes_accessed = (
        batch_pad * in_size * 4                       # x (f32)
        + batch_pad * out_pad * 2                     # padded output (bf16)
        + (w1b.size + w2b.size + w3b.size) * 2        # weights (bf16)
        + (b1b.size + b2b.size + b3b.size) * 2        # biases (bf16)
    )

    out_full = pl.pallas_call(
        dqn_kernel,
        out_shape=jax.ShapeDtypeStruct((batch_pad, out_pad), jnp.bfloat16),
        grid=(n_tiles,),
        in_specs=[
            # x: one (tm, in_size) tile per grid step
            pl.BlockSpec((tm, in_size), lambda i: (i, 0)),
            # weights/biases: full block, constant index -> VMEM-resident
            pl.BlockSpec((in_size, hidden), lambda i: (0, 0)),
            pl.BlockSpec((1, hidden), lambda i: (0, 0)),
            pl.BlockSpec((hidden, hidden), lambda i: (0, 0)),
            pl.BlockSpec((1, hidden), lambda i: (0, 0)),
            pl.BlockSpec((hidden, out_pad), lambda i: (0, 0)),
            pl.BlockSpec((1, out_pad), lambda i: (0, 0)),
        ],
        out_specs=pl.BlockSpec((tm, out_pad), lambda i: (i, 0)),
        compiler_params=pltpu.CompilerParams(
            dimension_semantics=("parallel",)),   # batch axis -> both TCs on v7x
        cost_estimate=pl.CostEstimate(
            flops=flops, transcendentals=0, bytes_accessed=bytes_accessed),
    )(x, w1b, b1b, w2b, b2b, w3b, b3b)

    # Drop batch padding and the zero-padded output lanes; upcast the tiny
    # (batch, 4) result back to f32.
    return out_full[:batch, :out_size].astype(jnp.float32)


def init_params(key, input_size=16, hidden_size=128, output_size=4):
    """Deterministic init mimicking torch.nn.Linear (uniform +/- 1/sqrt(fan_in))."""
    ks = jax.random.split(key, 6)

    def linear(kw, kb, fan_in, fan_out):
        bound = 1.0 / jnp.sqrt(fan_in)
        w = jax.random.uniform(kw, (fan_in, fan_out), jnp.float32, -bound, bound)
        b = jax.random.uniform(kb, (1, fan_out), jnp.float32, -bound, bound)
        return w, b

    w1, b1 = linear(ks[0], ks[1], input_size, hidden_size)
    w2, b2 = linear(ks[2], ks[3], hidden_size, hidden_size)
    w3, b3 = linear(ks[4], ks[5], hidden_size, output_size)
    return (w1, b1, w2, b2, w3, b3)


def dqn_reference(x, params):
    w1, b1, w2, b2, w3, b3 = params
    h1 = jnp.maximum(x @ w1 + b1, 0.0)
    h2 = jnp.maximum(h1 @ w2 + b2, 0.0)
    return h2 @ w3 + b3


if __name__ == "__main__":
    key = jax.random.PRNGKey(0)
    k_params, k_x1, k_x2 = jax.random.split(key, 3)

    input_size, hidden_size, output_size = 16, 128, 4
    params = init_params(k_params, input_size, hidden_size, output_size)
    prepared = prepare_params(params)   # hoisted one-time weight prep

    # Small single-env style batch (matches the original spec usage).
    x_small = jax.random.normal(k_x1, (8, input_size), jnp.float32)
    out_small = jax.block_until_ready(dqn_forward(x_small, prepared, output_size))
    ref_small = dqn_reference(x_small, params)
    assert out_small.shape == (8, output_size)
    assert jnp.allclose(out_small, ref_small, atol=3e-2, rtol=3e-2), \
        "mismatch vs reference (small batch)"

    # Replay-buffer style batch: exercises the 2-tile (megacore) path with
    # minimal batch padding (600 -> 2 x 304).
    x_big = jax.random.normal(k_x2, (600, input_size), jnp.float32)
    out_big = jax.block_until_ready(dqn_forward(x_big, prepared, output_size))
    ref_big = dqn_reference(x_big, params)
    assert out_big.shape == (600, output_size)
    assert jnp.allclose(out_big, ref_big, atol=3e-2, rtol=3e-2), \
        "mismatch vs reference (large batch)"

    print("KERNEL_OK")
</pallas_src>

<mosaic_0001>
module attributes {stable_mosaic.version = 11 : i64} {
  func.func @dqn_kernel(%arg0: i32, %arg1: memref<8x16xf32, #tpu.memory_space<vmem>>, %arg2: memref<16x128xbf16, #tpu.memory_space<vmem>>, %arg3: memref<1x128xbf16, #tpu.memory_space<vmem>>, %arg4: memref<128x128xbf16, #tpu.memory_space<vmem>>, %arg5: memref<1x128xbf16, #tpu.memory_space<vmem>>, %arg6: memref<128x128xbf16, #tpu.memory_space<vmem>>, %arg7: memref<1x128xbf16, #tpu.memory_space<vmem>>, %arg8: memref<8x128xbf16, #tpu.memory_space<vmem>>) attributes {dimension_semantics = [#tpu.dimension_semantics<parallel>], iteration_bounds = array<i64: 1>, scalar_prefetch = 0 : i64, scratch_operands = 0 : i64, tpu.core_type = #tpu.core_type<tc>, window_params = [{transform_indices = @transform_0, window_bounds = array<i64: 8, 16>}, {pipeline_mode = #tpu.pipeline_mode<synchronous>, transform_indices = @transform_1, window_bounds = array<i64: 16, 128>}, {pipeline_mode = #tpu.pipeline_mode<synchronous>, transform_indices = @transform_2, window_bounds = array<i64: 1, 128>}, {pipeline_mode = #tpu.pipeline_mode<synchronous>, transform_indices = @transform_3, window_bounds = array<i64: 128, 128>}, {pipeline_mode = #tpu.pipeline_mode<synchronous>, transform_indices = @transform_4, window_bounds = array<i64: 1, 128>}, {pipeline_mode = #tpu.pipeline_mode<synchronous>, transform_indices = @transform_5, window_bounds = array<i64: 128, 128>}, {pipeline_mode = #tpu.pipeline_mode<synchronous>, transform_indices = @transform_6, window_bounds = array<i64: 1, 128>}, {transform_indices = @transform_7, window_bounds = array<i64: 8, 128>}]} {
    %c0 = arith.constant 0 : index
    %c0_0 = arith.constant 0 : index
    %0 = vector.load %arg1[%c0, %c0_0] : memref<8x16xf32, #tpu.memory_space<vmem>>, vector<8x16xf32>
    %1 = arith.truncf %0 : vector<8x16xf32> to vector<8x16xbf16>
    %c0_1 = arith.constant 0 : index
    %c0_2 = arith.constant 0 : index
    %2 = vector.load %arg2[%c0_1, %c0_2] : memref<16x128xbf16, #tpu.memory_space<vmem>>, vector<16x128xbf16>
    %cst = arith.constant dense<0.000000e+00> : vector<8x128xf32>
    %3 = tpu.matmul %1, %2, %cst {dimension_numbers = #tpu.dot_dimension_numbers<[1], [0], [0], [1], [0, 0, 1, 1], [], []>} : vector<8x16xbf16>, vector<16x128xbf16>, vector<8x128xf32> -> vector<8x128xf32>
    %4 = arith.truncf %3 : vector<8x128xf32> to vector<8x128xbf16>
    %c0_3 = arith.constant 0 : index
    %c0_4 = arith.constant 0 : index
    %5 = vector.load %arg3[%c0_3, %c0_4] : memref<1x128xbf16, #tpu.memory_space<vmem>>, vector<1x128xbf16>
    %6 = vector.broadcast %5 : vector<1x128xbf16> to vector<8x128xbf16>
    %7 = arith.addf %4, %6 : vector<8x128xbf16>
    %cst_5 = arith.constant 0.000000e+00 : bf16
    %8 = vector.broadcast %cst_5 : bf16 to vector<8x128xbf16>
    %9 = arith.maximumf %7, %8 : vector<8x128xbf16>
    %c0_6 = arith.constant 0 : index
    %c0_7 = arith.constant 0 : index
    %10 = vector.load %arg4[%c0_6, %c0_7] : memref<128x128xbf16, #tpu.memory_space<vmem>>, vector<128x128xbf16>
    %cst_8 = arith.constant dense<0.000000e+00> : vector<8x128xf32>
    %11 = tpu.matmul %9, %10, %cst_8 {dimension_numbers = #tpu.dot_dimension_numbers<[1], [0], [0], [1], [0, 0, 1, 1], [], []>} : vector<8x128xbf16>, vector<128x128xbf16>, vector<8x128xf32> -> vector<8x128xf32>
    %12 = arith.truncf %11 : vector<8x128xf32> to vector<8x128xbf16>
    %c0_9 = arith.constant 0 : index
    %c0_10 = arith.constant 0 : index
    %13 = vector.load %arg5[%c0_9, %c0_10] : memref<1x128xbf16, #tpu.memory_space<vmem>>, vector<1x128xbf16>
    %14 = vector.broadcast %13 : vector<1x128xbf16> to vector<8x128xbf16>
    %15 = arith.addf %12, %14 : vector<8x128xbf16>
    %cst_11 = arith.constant 0.000000e+00 : bf16
    %16 = vector.broadcast %cst_11 : bf16 to vector<8x128xbf16>
    %17 = arith.maximumf %15, %16 : vector<8x128xbf16>
    %c0_12 = arith.constant 0 : index
    %c0_13 = arith.constant 0 : index
    %18 = vector.load %arg6[%c0_12, %c0_13] : memref<128x128xbf16, #tpu.memory_space<vmem>>, vector<128x128xbf16>
    %cst_14 = arith.constant dense<0.000000e+00> : vector<8x128xf32>
    %19 = tpu.matmul %17, %18, %cst_14 {dimension_numbers = #tpu.dot_dimension_numbers<[1], [0], [0], [1], [0, 0, 1, 1], [], []>} : vector<8x128xbf16>, vector<128x128xbf16>, vector<8x128xf32> -> vector<8x128xf32>
    %20 = arith.truncf %19 : vector<8x128xf32> to vector<8x128xbf16>
    %c0_15 = arith.constant 0 : index
    %c0_16 = arith.constant 0 : index
    %21 = vector.load %arg7[%c0_15, %c0_16] : memref<1x128xbf16, #tpu.memory_space<vmem>>, vector<1x128xbf16>
    %22 = vector.broadcast %21 : vector<1x128xbf16> to vector<8x128xbf16>
    %23 = arith.addf %20, %22 : vector<8x128xbf16>
    %c0_17 = arith.constant 0 : index
    %c0_18 = arith.constant 0 : index
    %24 = vector.load %arg8[%c0_17, %c0_18] : memref<8x128xbf16, #tpu.memory_space<vmem>>, vector<8x128xbf16>
    tpu.vector_store %arg8[%c0_17, %c0_18], %23 {strides = array<i32>} : memref<8x128xbf16, #tpu.memory_space<vmem>>, vector<8x128xbf16>,
    return
  }
  func.func @transform_0(%arg0: i32) -> (i32, i32) {
    %c0_i32 = arith.constant 0 : i32
    %c0_i32_0 = arith.constant 0 : i32
    return %arg0, %c0_i32 : i32, i32
  }
  func.func @transform_1(%arg0: i32) -> (i32, i32) {
    %c0_i32 = arith.constant 0 : i32
    %c0_i32_0 = arith.constant 0 : i32
    %c0_i32_1 = arith.constant 0 : i32
    return %c0_i32, %c0_i32_0 : i32, i32
  }
  func.func @transform_2(%arg0: i32) -> (i32, i32) {
    %c0_i32 = arith.constant 0 : i32
    %c0_i32_0 = arith.constant 0 : i32
    %c0_i32_1 = arith.constant 0 : i32
    return %c0_i32, %c0_i32_0 : i32, i32
  }
  func.func @transform_3(%arg0: i32) -> (i32, i32) {
    %c0_i32 = arith.constant 0 : i32
    %c0_i32_0 = arith.constant 0 : i32
    %c0_i32_1 = arith.constant 0 : i32
    return %c0_i32, %c0_i32_0 : i32, i32
  }
  func.func @transform_4(%arg0: i32) -> (i32, i32) {
    %c0_i32 = arith.constant 0 : i32
    %c0_i32_0 = arith.constant 0 : i32
    %c0_i32_1 = arith.constant 0 : i32
    return %c0_i32, %c0_i32_0 : i32, i32
  }
  func.func @transform_5(%arg0: i32) -> (i32, i32) {
    %c0_i32 = arith.constant 0 : i32
    %c0_i32_0 = arith.constant 0 : i32
    %c0_i32_1 = arith.constant 0 : i32
    return %c0_i32, %c0_i32_0 : i32, i32
  }
  func.func @transform_6(%arg0: i32) -> (i32, i32) {
    %c0_i32 = arith.constant 0 : i32
    %c0_i32_0 = arith.constant 0 : i32
    %c0_i32_1 = arith.constant 0 : i32
    return %c0_i32, %c0_i32_0 : i32, i32
  }
  func.func @transform_7(%arg0: i32) -> (i32, i32) {
    %c0_i32 = arith.constant 0 : i32
    %c0_i32_0 = arith.constant 0 : i32
    return %arg0, %c0_i32 : i32, i32
  }
}

</mosaic_0001>

<bundles_post_ra>
// kernel: dqn_forward.1
= control target key start
LH: loop header
LB: loop body
LE: loop exit
PB: predicated region body
PF: predicated region fallthrough
CT: control target
= control target key end

     0   :  { %12 = vsyncpa [#allocation3], 0  ;;  %s577_s0 = inlined_call_operand.hbm [shape: f32[8,16], index: 0, kind: input, shape index: {}]   ;;  %s578_s1 = inlined_call_operand.hbm [shape: bf16[16,128], index: 1, kind: input, shape index: {}]   ;;  %s579_s2 = inlined_call_operand.vmem [shape: bf16[1,128], index: 2, kind: input, shape index: {}]   ;;  %s580_s3 = inlined_call_operand.hbm [shape: bf16[128,128], index: 3, kind: input, shape index: {}]   ;;  %s581_s4 = inlined_call_operand.vmem [shape: bf16[1,128], index: 4, kind: input, shape index: {}]   ;;  %s582_s5 = inlined_call_operand.hbm [shape: bf16[128,128], index: 5, kind: input, shape index: {}]   ;;  %s583_s6 = inlined_call_operand.vmem [shape: bf16[1,128], index: 6, kind: input, shape index: {}]   ;;  %s584_s7 = inlined_call_operand.vmem [shape: bf16[8,128], index: 7, kind: output, shape index: {}]  }
   0x1   :  { %13 = vsyncpa [#allocation5], 0  ;;  %s30_s26 = sshll.u32 %s578_s1, 4  ;;  %s31_s26 = int_to_ptr.hbm [resolvable:$true] %s30_s26 }
   0x2   :  { %14 = vsyncpa [#allocation8], 0  ;;  %s507_s27 = smov [#allocation4]   ;;  %s20_s8 = sshll.u32 %s577_s0, 4  ;;  %s21_s8 = int_to_ptr.hbm [resolvable:$true] %s20_s8 }
   0x3   :  { %s32_s28 = sshll.u32 %s507_s27, 4  ;;  %s508_s9 = smov 64   ;;  %s33_s28 = int_to_ptr.vmem [resolvable:$true] %s32_s28 }
   0x4   :  { %s509_s10 = smov 4   ;;  %s510_s11 = smov [#allocation2]  }
   0x5   :  { %38 = dma.hbm_to_vmem [thread:$0]  %s31_s26, 128, %s33_s28, [#allocation5], %s508_s9, %s508_s9, %s509_s10  }
   0x6   :  { %s22_s12 = sshll.u32 %s510_s11, 4  ;;  %s45_s15 = sshll.u32 %s580_s3, 4  ;;  %s23_s12 = int_to_ptr.vmem [resolvable:$true] %s22_s12  ;;  %s46_s15 = int_to_ptr.hbm [resolvable:$true] %s45_s15 }
   0x7   :  { %25 = dma.hbm_to_vmem [thread:$0]  %s21_s8, 128, %s23_s12, [#allocation3]  }
   0x8   :  { %s60_s17 = sshll.u32 %s582_s5, 4  ;;  %s511_s18 = smov [#allocation6]   ;;  %s61_s17 = int_to_ptr.hbm [resolvable:$true] %s60_s17 }
   0x9   :  { %s47_s19 = sshll.u32 %s511_s18, 4  ;;  %s512_s0 = smov [#allocation7]   ;;  %s48_s19 = int_to_ptr.vmem [resolvable:$true] %s47_s19 }
   0xa   :  { %53 = dma.hbm_to_vmem [thread:$0]  %s46_s15, 1024, %s48_s19, [#allocation5], %s508_s9, %s508_s9, %s509_s10  }
   0xb   :  { %s62_s20 = sshll.u32 %s512_s0, 4  ;;  %s63_s20 = int_to_ptr.vmem [resolvable:$true] %s62_s20 }
   0xc   :  { %68 = dma.hbm_to_vmem [thread:$0]  %s61_s17, 1024, %s63_s20, [#allocation8], %s508_s9, %s508_s9, %s509_s10  }
   0xd   :  { %501 = dma.done.wait [#allocation3], 128  }
   0xe   :  { %502 = vsyncadd [#allocation3], 4294967168 }
   0xf   :  { %503 = dma.done.wait [#allocation5], 1152  }
  0x10   :  { %504 = vsyncadd [#allocation5], 4294966144 }
  0x11   :  { %505 = dma.done.wait [#allocation8], 1024  }
  0x12   :  { %506 = vsyncadd [#allocation8], 4294966272  ;;  %v382_v0 = vld [vmem:[#allocation4] sm:$0xff]  ;;  %v88_v1 = vld [vmem:[#allocation2] sm:$0xff]  ;;  %vm98_vm0 = vcmask 130048  }
  0x13   :  { %v390_v2 = vld [vmem:[#allocation6 + $0x38] sm:$0xff]  ;;  %v89_v3 = vpack.c.bf16 %v88_v1, %v88_v1  ;;  %109 = vmatpush.bf16.msra.mxu0 %v382_v0  ;;  %v389_v4 = vld [vmem:[#allocation6 + $0x30] sm:$0xff]  ;;  %v388_v5 = vld [vmem:[#allocation6 + $0x28] sm:$0xff] }
  0x14   :  { %192 = vmatpush.bf16.msra.mxu1 %v390_v2  ;;  %v387_v6 = vld [vmem:[#allocation6 + $0x20] sm:$0xff]  ;;  %v386_v7 = vld [vmem:[#allocation6 + $0x18] sm:$0xff]  ;;  %v385_v8 = vld [vmem:[#allocation6 + $0x10] sm:$0xff] }
  0x15   :  { %v384_v9 = vld [vmem:[#allocation6 + $0x8] sm:$0xff]  ;;  %v383_v10 = vld [vmem:[#allocation6] sm:$0xff]  ;;  %v398_v11 = vld [vmem:[#allocation7 + $0x38] sm:$0xff] }
  0x16   :  { %317 = vmatmul.msk.bf16.vlgmr.msra.gmra.mxu0 %vm98_vm0, %v89_v3  ;;  %282 = vmatpush.bf16.msra.mxu2 %v398_v11  ;;  %v397_v12 = vld [vmem:[#allocation7 + $0x30] sm:$0xff]  ;;  %v396_v13 = vld [vmem:[#allocation7 + $0x28] sm:$0xff]  ;;  %v395_v14 = vld [vmem:[#allocation7 + $0x20] sm:$0xff] }
  0x17   :  { %v116_v15 = vld [vmem:[%s579_s2] sm:$0x1]  ;;  %v394_v17 = vld [vmem:[#allocation7 + $0x18] sm:$0xff]  ;;  %v392_v28 = vld [vmem:[#allocation7 + $0x8] sm:$0xff] }
  0x18   :  { %193 = vmatpush.bf16.msra.mxu1 %v389_v4  ;;  %v118_v16 = vpack.i.b16 %v116_v15, %v116_v15  ;;  %v393_v27 = vld [vmem:[#allocation7 + $0x10] sm:$0xff]  ;;  %v391_v29 = vld [vmem:[#allocation7] sm:$0xff] }
  0x19   :  { %v206_v30 = vld [vmem:[%s581_s4] sm:$0x1] }
  0x1a   :  { %283 = vmatpush.bf16.msra.mxu2 %v397_v12  ;;  %v120_v18 = vperm.slane %v118_v16, 0  ;;  %v208_v31 = vpack.i.b16 %v206_v30, %v206_v30  ;;  %v296_v41 = vld [vmem:[%s583_s6] sm:$0x1] }
  0x1b   :  { %v298_v42 = vpack.i.b16 %v296_v41, %v296_v41 }
  0x1c   :  { %194 = vmatpush.bf16.msra.mxu1 %v388_v5  ;;  %v122_v21 = vunpack.c.l.bf16 %v120_v18  ;;  %v210_v32 = vperm.slane %v208_v31, 0 }
  0x1d   :  { %v300_v43 = vperm.slane %v298_v42, 0 }
  0x1e   :  { %284 = vmatpush.bf16.msra.mxu2 %v396_v13  ;;  %v212_v35 = vunpack.c.l.bf16 %v210_v32 }
  0x1f   :  { %v302_v46 = vunpack.c.l.bf16 %v300_v43 }
  0x20   :  { %195 = vmatpush.bf16.msra.mxu1 %v387_v6 }
  0x22   :  { %285 = vmatpush.bf16.msra.mxu2 %v395_v14 }
  0x24   :  { %196 = vmatpush.bf16.msra.mxu1 %v386_v7 }
  0x26   :  { %286 = vmatpush.bf16.msra.mxu2 %v394_v17 }
  0x28   :  { %197 = vmatpush.bf16.msra.mxu1 %v385_v8 }
  0x2a   :  { %287 = vmatpush.bf16.msra.mxu2 %v393_v27 }
  0x2c   :  { %198 = vmatpush.bf16.msra.mxu1 %v384_v9 }
  0x2e   :  { %288 = vmatpush.bf16.msra.mxu2 %v392_v28 }
  0x30   :  { %199 = vmatpush.bf16.msra.mxu1 %v383_v10 }
  0x32   :  { %289 = vmatpush.bf16.msra.mxu2 %v391_v29 }
  0x93   :  { %v111_v19 = vpop.f32.mrf.mxu0 }
  0x94   :  { %v115_v20 = vpack.c.bf16 %v111_v19, %v111_v19 }
  0x96   :  { %v121_v22 = vunpack.c.l.bf16 %v115_v20 }
  0x98   :  { %v123_v23 = vadd.f32 %v122_v21, %v121_v22 }
  0x9a   :  { %v126_v24 = vmax.f32 %v123_v23, 0.0 }
  0x9b   :  { %v113_v25 = vpop.f32.mrf.mxu0 }
  0x9c   :  { %v127_v26 = vpack.c.bf16 %v126_v24, %v126_v24 }
  0x9e   :  { %200 = vmatmul.bf16.vlgmr.msra.gmra.mxu1 %v127_v26 }
 0x11b   :  { %v201_v33 = vpop.f32.mrf.mxu1 }
 0x11c   :  { %v205_v34 = vpack.c.bf16 %v201_v33, %v201_v33 }
 0x11e   :  { %v211_v36 = vunpack.c.l.bf16 %v205_v34 }
 0x120   :  { %v213_v37 = vadd.f32 %v212_v35, %v211_v36 }
 0x122   :  { %v216_v38 = vmax.f32 %v213_v37, 0.0 }
 0x123   :  { %v203_v39 = vpop.f32.mrf.mxu1 }
 0x124   :  { %v217_v40 = vpack.c.bf16 %v216_v38, %v216_v38 }
 0x126   :  { %290 = vmatmul.bf16.vlgmr.msra.gmra.mxu2 %v217_v40 }
 0x1a9   :  { %v291_v44 = vpop.f32.mrf.mxu2 }
 0x1aa   :  { %v295_v45 = vpack.c.bf16 %v291_v44, %v291_v44 }
 0x1ac   :  { %v301_v47 = vunpack.c.l.bf16 %v295_v45 }
 0x1ae   :  { %v303_v48 = vadd.f32 %v302_v46, %v301_v47 }
 0x1b0   :  { %v304_v49 = vpack.c.bf16 %v303_v48, %v303_v48 }
 0x1b1   :  { %v293_v50 = vpop.f32.mrf.mxu2 }
 0x1b2   :  { %305 = vst [vmem:[%s584_s7] sm:$0xf] %v304_v49 }
 0x1b3   :  { %310 = vsyncpa [#allocation3], 1 }
 0x1b4   :  { %311 = vsyncpa [#allocation5], 1 }
 0x1b5   :  { %312 = vsyncpa [#allocation8], 1 }

</bundles_post_ra>
